<compile_context>
chip_gen: v7x
topology: tpu7x:2x2x1
jax: 0.10.0
libtpu: 0.0.40
codegen_flags: <defaults>
</compile_context>

<pallas_src>
import jax
import jax.numpy as jnp
from jax import lax
from jax.experimental import pallas as pl
from jax.experimental.pallas import tpu as pltpu
import numpy as np

_LANE = 128
_SUBLANE = 8


def _electra_head_kernel(x_ref, w1_ref, b1_ref, w2_ref, b2_ref, o_ref):
    """dense -> exact GELU -> out_proj on one (TB, H) CLS batch tile.

    Weights/biases use constant index_maps, so they stay resident in VMEM
    across grid steps; only the x / o tiles are streamed per step.
    MXU inputs keep their native dtype (f32 accumulate); the GELU stays in
    f32 (v5e has no bf16 VPU/EUP path, and it is never the bottleneck).
    """
    # dense: (TB, H) @ (H, H) on the MXU, f32 accumulation.
    h = jnp.dot(x_ref[...], w1_ref[...], preferred_element_type=jnp.float32)
    h = h + b1_ref[...].astype(jnp.float32)

    # exact (erf-based) GELU, matching HF get_activation('gelu').
    h = 0.5 * h * (1.0 + lax.erf(h * jnp.float32(0.7071067811865476)))

    # out_proj: (TB, H) @ (H, L_pad) on the MXU, f32 accumulation.
    # Cast the activation down to the weight dtype (no-op for f32 params) so
    # bf16 weights use the native bf16 MXU path instead of being up-cast.
    o = jnp.dot(h.astype(w2_ref.dtype), w2_ref[...],
                preferred_element_type=jnp.float32)
    o = o + b2_ref[...].astype(jnp.float32)

    o_ref[...] = o.astype(o_ref.dtype)


def electra_classification_head(features, w_dense, b_dense, w_out, b_out,
                                *, block_b=256):
    """features: (B, S, H).  Returns logits (B, num_labels)."""
    B, S, H = features.shape
    L = w_out.shape[1]
    L_pad = _LANE * pl.cdiv(L, _LANE)

    # CLS token.  Kept wrapper-side: a (TB, 1, H) block on the (B, S, H) input
    # would place a size-1 block on the second-minor (seq) axis and violate the
    # (8, 128) block-tiling constraint; the extra B*H copy is negligible next
    # to the resident H*H weight traffic.
    x0 = features[:, 0, :]

    # nn.Dropout is identity at inference time -> nothing to emit.

    # Lane-dense out_proj: pad num_labels up to a multiple of 128 so output
    # stores are full (unmasked) vst; zero-padded columns produce zero logits
    # that are sliced off after the call.
    if L_pad != L:
        w_out_p = jnp.pad(w_out, ((0, 0), (0, L_pad - L)))
        b_out_p = jnp.pad(b_out, ((0, L_pad - L),))
    else:
        w_out_p, b_out_p = w_out, b_out

    b1 = b_dense.reshape(1, H)          # 2-D for VMEM layout
    b2 = b_out_p.reshape(1, L_pad)

    # Batch tile: >=256 fills the 256-wide MXU on v6e/v7x; shrink if the
    # streamed (double-buffered) x/o tiles would crowd the 32 MiB scoped-VMEM
    # default (matters on v7x: 64 MiB physical VMEM per TC).
    itemsize = max(int(jnp.dtype(features.dtype).itemsize), 4)
    tb = block_b if B >= block_b else B
    io_budget = 16 * 1024 * 1024
    while tb > _SUBLANE and 2 * tb * (H + L_pad) * itemsize > io_budget:
        tb //= 2
    grid = (pl.cdiv(B, tb),)

    cost = pl.CostEstimate(
        flops=2 * B * H * H + 2 * B * H * L_pad + 8 * B * H,
        transcendentals=B * H,
        bytes_accessed=itemsize * (B * H + H * H + H * L_pad + H + L_pad)
        + itemsize * B * L_pad,
    )

    out = pl.pallas_call(
        _electra_head_kernel,
        out_shape=jax.ShapeDtypeStruct((B, L_pad), features.dtype),
        grid=grid,
        in_specs=[
            pl.BlockSpec((tb, H), lambda i: (i, 0)),      # x: streamed per tile
            pl.BlockSpec((H, H), lambda i: (0, 0)),       # dense weight: resident
            pl.BlockSpec((1, H), lambda i: (0, 0)),       # dense bias: resident
            pl.BlockSpec((H, L_pad), lambda i: (0, 0)),   # out_proj weight: resident
            pl.BlockSpec((1, L_pad), lambda i: (0, 0)),   # out_proj bias: resident
        ],
        out_specs=pl.BlockSpec((tb, L_pad), lambda i: (i, 0)),
        compiler_params=pltpu.CompilerParams(
            # independent batch tiles -> shard across v7x's two TensorCores
            dimension_semantics=("parallel",)),
        cost_estimate=cost,
    )(x0, w_dense, b1, w_out_p, b2)

    return out[:, :L]


def _reference(features, w_dense, b_dense, w_out, b_out):
    x = features[:, 0, :]
    h = x @ w_dense + b_dense
    h = 0.5 * h * (1.0 + lax.erf(h / jnp.sqrt(2.0)))
    return h @ w_out + b_out


if __name__ == "__main__":
    # Small config: batch=2, seq=8, hidden=32, num_labels=6
    B, S, H, L = 2, 8, 32, 6

    key = jax.random.PRNGKey(0)
    k_feat, k_w1, k_b1, k_w2, k_b2 = jax.random.split(key, 5)

    features = jax.random.normal(k_feat, (B, S, H), dtype=jnp.float32)
    # Weights stored as (in, out) — i.e. the transpose of PyTorch's (out, in).
    w_dense = jax.random.normal(k_w1, (H, H), dtype=jnp.float32) * (1.0 / np.sqrt(H))
    b_dense = jax.random.normal(k_b1, (H,), dtype=jnp.float32) * 0.02
    w_out = jax.random.normal(k_w2, (H, L), dtype=jnp.float32) * (1.0 / np.sqrt(H))
    b_out = jax.random.normal(k_b2, (L,), dtype=jnp.float32) * 0.02

    logits = electra_classification_head(features, w_dense, b_dense, w_out, b_out)
    logits = jax.block_until_ready(logits)

    ref = _reference(features, w_dense, b_dense, w_out, b_out)
    np.testing.assert_allclose(np.asarray(logits), np.asarray(ref),
                               rtol=1e-5, atol=1e-5)

    print("KERNEL_OK")
</pallas_src>

<mosaic_0001>
module attributes {stable_mosaic.version = 11 : i64} {
  func.func @_electra_head_kernel(%arg0: i32, %arg1: memref<2x32xf32, #tpu.memory_space<vmem>>, %arg2: memref<32x32xf32, #tpu.memory_space<vmem>>, %arg3: memref<1x32xf32, #tpu.memory_space<vmem>>, %arg4: memref<32x128xf32, #tpu.memory_space<vmem>>, %arg5: memref<1x128xf32, #tpu.memory_space<vmem>>, %arg6: memref<2x128xf32, #tpu.memory_space<vmem>>) attributes {dimension_semantics = [#tpu.dimension_semantics<parallel>], iteration_bounds = array<i64: 1>, scalar_prefetch = 0 : i64, scratch_operands = 0 : i64, tpu.core_type = #tpu.core_type<tc>, window_params = [{transform_indices = @transform_0, window_bounds = array<i64: 2, 32>}, {pipeline_mode = #tpu.pipeline_mode<synchronous>, transform_indices = @transform_1, window_bounds = array<i64: 32, 32>}, {pipeline_mode = #tpu.pipeline_mode<synchronous>, transform_indices = @transform_2, window_bounds = array<i64: 1, 32>}, {pipeline_mode = #tpu.pipeline_mode<synchronous>, transform_indices = @transform_3, window_bounds = array<i64: 32, 128>}, {pipeline_mode = #tpu.pipeline_mode<synchronous>, transform_indices = @transform_4, window_bounds = array<i64: 1, 128>}, {transform_indices = @transform_5, window_bounds = array<i64: 2, 128>}]} {
    %c0 = arith.constant 0 : index
    %c0_0 = arith.constant 0 : index
    %0 = vector.load %arg1[%c0, %c0_0] : memref<2x32xf32, #tpu.memory_space<vmem>>, vector<2x32xf32>
    %c0_1 = arith.constant 0 : index
    %c0_2 = arith.constant 0 : index
    %1 = vector.load %arg2[%c0_1, %c0_2] : memref<32x32xf32, #tpu.memory_space<vmem>>, vector<32x32xf32>
    %cst = arith.constant dense<0.000000e+00> : vector<2x32xf32>
    %2 = tpu.matmul %0, %1, %cst {dimension_numbers = #tpu.dot_dimension_numbers<[1], [0], [0], [1], [0, 0, 1, 1], [], []>} : vector<2x32xf32>, vector<32x32xf32>, vector<2x32xf32> -> vector<2x32xf32>
    %c0_3 = arith.constant 0 : index
    %c0_4 = arith.constant 0 : index
    %3 = vector.load %arg3[%c0_3, %c0_4] : memref<1x32xf32, #tpu.memory_space<vmem>>, vector<1x32xf32>
    %4 = vector.broadcast %3 : vector<1x32xf32> to vector<2x32xf32>
    %5 = arith.addf %2, %4 : vector<2x32xf32>
    %cst_5 = arith.constant 5.000000e-01 : f32
    %6 = vector.broadcast %cst_5 : f32 to vector<2x32xf32>
    %7 = arith.mulf %6, %5 : vector<2x32xf32>
    %cst_6 = arith.constant 0.707106769 : f32
    %8 = vector.broadcast %cst_6 : f32 to vector<2x32xf32>
    %9 = arith.mulf %5, %8 : vector<2x32xf32>
    %10 = math.erf %9 : vector<2x32xf32>
    %cst_7 = arith.constant 1.000000e+00 : f32
    %11 = vector.broadcast %cst_7 : f32 to vector<2x32xf32>
    %12 = arith.addf %11, %10 : vector<2x32xf32>
    %13 = arith.mulf %7, %12 : vector<2x32xf32>
    %c0_8 = arith.constant 0 : index
    %c0_9 = arith.constant 0 : index
    %14 = vector.load %arg4[%c0_8, %c0_9] : memref<32x128xf32, #tpu.memory_space<vmem>>, vector<32x128xf32>
    %cst_10 = arith.constant dense<0.000000e+00> : vector<2x128xf32>
    %15 = tpu.matmul %13, %14, %cst_10 {dimension_numbers = #tpu.dot_dimension_numbers<[1], [0], [0], [1], [0, 0, 1, 1], [], []>} : vector<2x32xf32>, vector<32x128xf32>, vector<2x128xf32> -> vector<2x128xf32>
    %c0_11 = arith.constant 0 : index
    %c0_12 = arith.constant 0 : index
    %16 = vector.load %arg5[%c0_11, %c0_12] : memref<1x128xf32, #tpu.memory_space<vmem>>, vector<1x128xf32>
    %17 = vector.broadcast %16 : vector<1x128xf32> to vector<2x128xf32>
    %18 = arith.addf %15, %17 : vector<2x128xf32>
    %c0_13 = arith.constant 0 : index
    %c0_14 = arith.constant 0 : index
    %19 = vector.load %arg6[%c0_13, %c0_14] : memref<2x128xf32, #tpu.memory_space<vmem>>, vector<2x128xf32>
    tpu.vector_store %arg6[%c0_13, %c0_14], %18 {strides = array<i32>} : memref<2x128xf32, #tpu.memory_space<vmem>>, vector<2x128xf32>,
    return
  }
  func.func @transform_0(%arg0: i32) -> (i32, i32) {
    %c0_i32 = arith.constant 0 : i32
    %c0_i32_0 = arith.constant 0 : i32
    return %arg0, %c0_i32 : i32, i32
  }
  func.func @transform_1(%arg0: i32) -> (i32, i32) {
    %c0_i32 = arith.constant 0 : i32
    %c0_i32_0 = arith.constant 0 : i32
    %c0_i32_1 = arith.constant 0 : i32
    return %c0_i32, %c0_i32_0 : i32, i32
  }
  func.func @transform_2(%arg0: i32) -> (i32, i32) {
    %c0_i32 = arith.constant 0 : i32
    %c0_i32_0 = arith.constant 0 : i32
    %c0_i32_1 = arith.constant 0 : i32
    return %c0_i32, %c0_i32_0 : i32, i32
  }
  func.func @transform_3(%arg0: i32) -> (i32, i32) {
    %c0_i32 = arith.constant 0 : i32
    %c0_i32_0 = arith.constant 0 : i32
    %c0_i32_1 = arith.constant 0 : i32
    return %c0_i32, %c0_i32_0 : i32, i32
  }
  func.func @transform_4(%arg0: i32) -> (i32, i32) {
    %c0_i32 = arith.constant 0 : i32
    %c0_i32_0 = arith.constant 0 : i32
    %c0_i32_1 = arith.constant 0 : i32
    return %c0_i32, %c0_i32_0 : i32, i32
  }
  func.func @transform_5(%arg0: i32) -> (i32, i32) {
    %c0_i32 = arith.constant 0 : i32
    %c0_i32_0 = arith.constant 0 : i32
    return %arg0, %c0_i32 : i32, i32
  }
}

</mosaic_0001>

<bundles_post_ra>
// kernel: tpu_custom_call.1
= control target key start
LH: loop header
LB: loop body
LE: loop exit
PB: predicated region body
PF: predicated region fallthrough
CT: control target
= control target key end

     0   :  { %10 = vsyncpa [#allocation3], 0  ;;  %s506_s0 = inlined_call_operand.hbm [shape: f32[2,32], index: 0, kind: input, shape index: {}]   ;;  %s507_s1 = inlined_call_operand.hbm [shape: f32[32,32], index: 1, kind: input, shape index: {}]   ;;  %s508_s2 = inlined_call_operand.vmem [shape: f32[1,32], index: 2, kind: input, shape index: {}]   ;;  %s509_s3 = inlined_call_operand.hbm [shape: f32[32,128], index: 3, kind: input, shape index: {}]   ;;  %s510_s4 = inlined_call_operand.vmem [shape: f32[1,128], index: 4, kind: input, shape index: {}]   ;;  %s511_s5 = inlined_call_operand.hbm [shape: f32[2,128], index: 5, kind: output, shape index: {}]  }
   0x1   :  { %11 = vsyncpa [#allocation6], 0 }
   0x2   :  { %12 = vsyncpa [#allocation4], 0  ;;  %s405_s18 = smov [#allocation5]   ;;  %s311_s22 = scalar_lea.hbm %s507_s1, 512 }
   0x3   :  { %s28_s19 = sshll.u32 %s405_s18, 4  ;;  %p312_p0 = scmp.ne.s32.totalorder %s507_s1, %s311_s22  ;;  %s29_s19 = int_to_ptr.vmem [resolvable:$true] %s28_s19 }
   0x4   :  { %p315_p1 = scmp.lt.u32.totalorder %s311_s22, %s507_s1 }
   0x6   :  { %p317_p2 = pnand %p315_p1, %p312_p0 }
   0x8   :  { %320 = shalt.err (!%p317_p2)
}
   0x9   :  { %s321_s27 = scalar_lea.vmem %s29_s19, 512  ;;  %p326_p4 = scmp.lt.s32.totalorder %s29_s19, %s29_s19 }
   0xa   :  { %p322_p3 = scmp.ne.s32.totalorder %s29_s19, %s321_s27  ;;  %p327_p5 = scmp.lt.s32.totalorder %s321_s27, %s321_s27 }
   0xc   :  { %p328_p6 = por %p327_p5, %p326_p4 }
   0xe   :  { %p329_p7 = pnand %p328_p6, %p322_p3 }
  0x10   :  { %332 = shalt.err (!%p329_p7)
}
  0x11   :  { %s406_s28 = smov 128   ;;  %s407_s29 = smov 8  }
  0x12   :  { %34 = dma.hbm_to_vmem [thread:$0]  %s507_s1, 512, %s29_s19, [#allocation6], %s406_s28, %s406_s28, %s407_s29  }
  0x13   :  { %s408_s7 = smov [#allocation2]   ;;  %s409_s9 = smov [#allocation7]  }
  0x14   :  { %s19_s8 = sshll.u32 %s408_s7, 4  ;;  %s42_s10 = sshll.u32 %s409_s9, 4  ;;  %s20_s8 = int_to_ptr.vmem [resolvable:$true] %s19_s8  ;;  %s43_s10 = int_to_ptr.vmem [resolvable:$true] %s42_s10 }
  0x15   :  { %s333_s13 = scalar_lea.hbm %s506_s0, 32 }
  0x16   :  { %p334_p8 = scmp.ne.s32.totalorder %s506_s0, %s333_s13  ;;  %p337_p9 = scmp.lt.u32.totalorder %s333_s13, %s506_s0 }
  0x18   :  { %p339_p10 = pnand %p337_p9, %p334_p8 }
  0x1a   :  { %342 = shalt.err (!%p339_p10)
}
  0x1b   :  { %s343_s1 = scalar_lea.vmem %s20_s8, 32  ;;  %p348_p12 = scmp.lt.s32.totalorder %s20_s8, %s20_s8 }
  0x1c   :  { %p344_p11 = scmp.ne.s32.totalorder %s20_s8, %s343_s1  ;;  %p349_p13 = scmp.lt.s32.totalorder %s343_s1, %s343_s1 }
  0x1e   :  { %p350_p0 = por %p349_p13, %p348_p12 }
  0x20   :  { %p351_p1 = pnand %p350_p0, %p344_p11 }
  0x22   :  { %354 = shalt.err (!%p351_p1)
}
  0x23   :  { %22 = dma.hbm_to_vmem [thread:$0]  %s506_s0, 32, %s20_s8, [#allocation3]  }
  0x24   :  { %s355_s22 = scalar_lea.hbm %s509_s3, 512 }
  0x25   :  { %p356_p2 = scmp.ne.s32.totalorder %s509_s3, %s355_s22  ;;  %p359_p3 = scmp.lt.u32.totalorder %s355_s22, %s509_s3 }
  0x27   :  { %p361_p4 = pnand %p359_p3, %p356_p2 }
  0x29   :  { %364 = shalt.err (!%p361_p4)
}
  0x2a   :  { %s365_s27 = scalar_lea.vmem %s43_s10, 512  ;;  %p370_p6 = scmp.lt.s32.totalorder %s43_s10, %s43_s10 }
  0x2b   :  { %p366_p5 = scmp.ne.s32.totalorder %s43_s10, %s365_s27  ;;  %p371_p7 = scmp.lt.s32.totalorder %s365_s27, %s365_s27 }
  0x2d   :  { %p372_p8 = por %p371_p7, %p370_p6 }
  0x2f   :  { %p373_p9 = pnand %p372_p8, %p366_p5 }
  0x31   :  { %376 = shalt.err (!%p373_p9)
}
  0x32   :  { %48 = dma.hbm_to_vmem [thread:$0]  %s509_s3, 512, %s43_s10, [#allocation6], %s406_s28, %s406_s28, %s407_s29  }
  0x33   :  { %399 = dma.done.wait [#allocation3], 32  }
  0x34   :  { %400 = vsyncadd [#allocation3], 4294967264 }
  0x35   :  { %401 = dma.done.wait [#allocation6], 1024  }
  0x36   :  { %402 = vsyncadd [#allocation6], 4294966272  ;;  %v410_v0 = vmov 0.0|0.0   ;;  %vm411_vm0 = vmmov 0   ;;  %v412_v1 = vmov 0.0   ;;  %v61_v2 = vld [vmem:[#allocation5] sm:$0xff] }
  0x37   :  { %288 = vmatprep.subr.bf16.mxu0 %v410_v0  ;;  %274 = vmatprep.mubr.msk.f32.mxu0 %vm411_vm0, %v412_v1  ;;  %v62_v3 = vld [vmem:[#allocation5 + $0x8] sm:$0xff]  ;;  %v63_v4 = vld [vmem:[#allocation5 + $0x10] sm:$0xff]  ;;  %v64_v6 = vld [vmem:[#allocation5 + $0x18] sm:$0xff]  ;;  %vm72_vm1 = vcmask 261120   ;;  %s413_s7 = smov [#allocation8]  }
  0x38   :  { %294 = vmatprep.subr.bf16.mxu1 %v410_v0  ;;  %285 = vmatprep.mubr.msk.f32.mxu1 %vm411_vm0, %v412_v1  ;;  %v289_v5 = vpack.c.bf16 %v62_v3, %v61_v2  ;;  %v292_v7 = vpack.c.bf16 %v64_v6, %v63_v4  ;;  %v60_v8 = vld [vmem:[#allocation2] sm:$0x3]  ;;  %v151_v9 = vld [vmem:[#allocation7] sm:$0xff]  ;;  %v152_v10 = vld [vmem:[#allocation7 + $0x8] sm:$0xff]  ;;  %s242_s8 = sshll.u32 %s413_s7, 4  ;;  %s243_s8 = int_to_ptr.vmem [resolvable:$true] %s242_s8 }
  0x39   :  { %v295_v11 = vpack.c.bf16 %v152_v10, %v151_v9  ;;  %v153_v12 = vld [vmem:[#allocation7 + $0x10] sm:$0xff]  ;;  %v154_v13 = vld [vmem:[#allocation7 + $0x18] sm:$0xff]  ;;  %p382_p11 = scmp.lt.s32.totalorder %s243_s8, %s243_s8 }
  0x3a   :  { %290 = vmatpush3.bf16.msra.mxu0 %v289_v5  ;;  %v298_v14 = vpack.c.bf16 %v154_v13, %v153_v12  ;;  %v252_v15 = vld [vmem:[%s508_s2] ss:$0 sm:$0xff]  ;;  %s377_s2 = scalar_lea.vmem %s243_s8, 32 }
  0x3b   :  { %291 = vmatprep.subr.bf16.mxu0 %v410_v0  ;;  %296 = vmatpush3.bf16.msra.mxu1 %v295_v11  ;;  %v254_v24 = vld [vmem:[%s510_s4] ss:$0 sm:$0xff]  ;;  %p378_p10 = scmp.ne.s32.totalorder %s243_s8, %s377_s2  ;;  %p383_p12 = scmp.lt.s32.totalorder %s377_s2, %s377_s2 }
  0x3c   :  { %297 = vmatprep.subr.bf16.mxu1 %v410_v0 }
  0x3d   :  { %p384_p13 = por %p383_p12, %p382_p11 }
  0x3e   :  { %293 = vmatpush3.bf16.msra.mxu0 %v292_v7 }
  0x3f   :  { %299 = vmatpush3.bf16.msra.mxu1 %v298_v14  ;;  %p385_p0 = pnand %p384_p13, %p378_p10 }
  0x41   :  { %275 = vmatmul.mubr.msk.f32.vlgmr.msra.gmra.mrb[0].mxu0 %vm72_vm1, %v60_v8 }
 0x114   :  { %v142_v16 = vpop.f32.mrb[0].mxu0 }
 0x115   :  { %v143_v17 = vadd.f32 %v252_v15, %v142_v16  ;;  %v276_v18 = vpop.f32.mrb[1].mxu0 }
 0x117   :  { %v147_v19 = vmul.f32 0.70710677, %v143_v17  ;;  %v146_v21 = vmul.f32 0.5, %v143_v17 }
 0x119   :  { %309 = verf.f32 %v147_v19 }
 0x123   :  { %v310_v20 = vpop.eup %309 }
 0x124   :  { %v149_v22 = vadd.f32 1.0, %v310_v20 }
 0x126   :  { %v150_v23 = vmul.f32 %v149_v22, %v146_v21 }
 0x128   :  { %286 = vmatmul.mubr.msk.f32.vlgmr.msra.gmra.mrb[0].mxu1 %vm72_vm1, %v150_v23 }
 0x1fb   :  { %v231_v25 = vpop.f32.mrb[0].mxu1 }
 0x1fc   :  { %v232_v26 = vadd.f32 %v254_v24, %v231_v25  ;;  %v287_v27 = vpop.f32.mrb[1].mxu1 }
 0x1fe   :  { %235 = vst [vmem:[#allocation8] sm:$0x3] %v232_v26 }
 0x1ff   :  { %388 = shalt.err (!%p385_p0)
}
 0x200   :  { %s389_s11 = scalar_lea.hbm %s511_s5, 32 }
 0x201   :  { %p390_p1 = scmp.ne.s32.totalorder %s511_s5, %s389_s11  ;;  %p393_p2 = scmp.lt.u32.totalorder %s389_s11, %s511_s5 }
 0x203   :  { %p395_p3 = pnand %p393_p2, %p390_p1 }
 0x205   :  { %398 = shalt.err (!%p395_p3)
}
 0x206   :  { %245 = dma.vmem_to_hbm [thread:$0]  %s243_s8, 32, %s511_s5, [#allocation4]  }
 0x207   :  { %403 = dma.done.wait [#allocation4], 32  }
 0x208   :  { %404 = vsyncadd [#allocation4], 4294967264 }
 0x209   :  { %249 = vsyncpa [#allocation3], 1 }
 0x20a   :  { %250 = vsyncpa [#allocation6], 1 }
 0x20b   :  { %251 = vsyncpa [#allocation4], 1 }

</bundles_post_ra>
